<compile_context>
chip_gen: v6e
topology: v6e:2x2x1
jax: 0.10.0
libtpu: 0.0.40
codegen_flags: <defaults>
</compile_context>

<pallas_src>
import functools

import jax
import jax.numpy as jnp
from jax.experimental import pallas as pl
from jax.experimental.pallas import tpu as pltpu


def _scaled_row_kernel(x1_ref, x2rep_ref, o_ref):
    """Fast path for M == 1, K == 1: out = x1[0,0] * tiled(x2)."""
    s = x1_ref[0, 0].astype(jnp.float32)              # scalar from SMEM
    row = x2rep_ref[...].astype(jnp.float32)          # (1, num_repeats*N) in VMEM
    o_ref[...] = (s * row).astype(o_ref.dtype)        # single lane-dense store


def _mm_cat_kernel(x1_ref, x2_ref, o_ref, *, num_repeats, n):
    """General fallback: real matmul (f32 accumulate) + unrolled replicated stores."""
    v = jnp.dot(
        x1_ref[...].astype(jnp.float32),
        x2_ref[...].astype(jnp.float32),
        preferred_element_type=jnp.float32,
    ).astype(o_ref.dtype)
    for r in range(num_repeats):                       # static unroll, lane-dense per slot
        o_ref[:, pl.ds(r * n, n)] = v


def model_forward(x1, x2, num_repeats=5):
    M, K = x1.shape
    K2, N = x2.shape
    assert K == K2, (x1.shape, x2.shape)
    out_dtype = jnp.result_type(x1.dtype, x2.dtype)
    out_shape = jax.ShapeDtypeStruct((M, num_repeats * N), out_dtype)

    if M == 1 and K == 1:
        # Pre-tile x2 once on the XLA side (8 bytes) -> no in-kernel concat.
        x2_rep = jnp.tile(x2, (1, num_repeats))       # (1, num_repeats*N)
        return pl.pallas_call(
            _scaled_row_kernel,
            out_shape=out_shape,
            # No grid: single invocation; x1 lives in SMEM (scalar), x2_rep in VMEM.
            in_specs=[
                pl.BlockSpec(memory_space=pltpu.MemorySpace.SMEM),
                pl.BlockSpec(memory_space=pltpu.MemorySpace.VMEM),
            ],
            out_specs=pl.BlockSpec(memory_space=pltpu.MemorySpace.VMEM),
        )(x1, x2_rep)

    # TODO(synk): for large M/N/K this fallback should get a tiled grid
    # (tm, tn, tk multiples of 128/256 per chip generation, K axis "arbitrary",
    # f32 VMEM accumulator) instead of full-resident arrays.
    kernel = functools.partial(_mm_cat_kernel, num_repeats=num_repeats, n=N)
    return pl.pallas_call(
        kernel,
        out_shape=out_shape,
        in_specs=[
            pl.BlockSpec(memory_space=pltpu.MemorySpace.VMEM),
            pl.BlockSpec(memory_space=pltpu.MemorySpace.VMEM),
        ],
        out_specs=pl.BlockSpec(memory_space=pltpu.MemorySpace.VMEM),
    )(x1, x2)


if __name__ == "__main__":
    key = jax.random.PRNGKey(0)
    k1, k2 = jax.random.split(key)
    # Shapes from the module: x1 = randn(1, 1), x2 = randn(1, 2)
    x1 = jax.random.normal(k1, (1, 1), dtype=jnp.float32)
    x2 = jax.random.normal(k2, (1, 2), dtype=jnp.float32)

    out = jax.block_until_ready(model_forward(x1, x2))

    # Reference check in plain JAX (mirrors the torch module exactly).
    v = x1 @ x2
    ref = jnp.concatenate([v, v, v, v, v], axis=1)
    assert out.shape == (1, 10), out.shape
    assert jnp.allclose(out, ref, atol=1e-6), (out, ref)

    print("KERNEL_OK")
</pallas_src>

<mosaic_0001>
module attributes {stable_mosaic.version = 11 : i64} {
  func.func @_scaled_row_kernel(%arg0: memref<1x1xf32, #tpu.memory_space<smem>>, %arg1: memref<1x10xf32, #tpu.memory_space<vmem>>, %arg2: memref<1x10xf32, #tpu.memory_space<vmem>>) attributes {dimension_semantics = [], scalar_prefetch = 0 : i64, scratch_operands = 0 : i64, tpu.core_type = #tpu.core_type<tc>} {
    %c0 = arith.constant 0 : index
    %c0_0 = arith.constant 0 : index
    %0 = memref.load %arg0[%c0, %c0_0] : memref<1x1xf32, #tpu.memory_space<smem>>
    %c0_1 = arith.constant 0 : index
    %c0_2 = arith.constant 0 : index
    %1 = vector.load %arg1[%c0_1, %c0_2] : memref<1x10xf32, #tpu.memory_space<vmem>>, vector<1x10xf32>
    %2 = vector.broadcast %0 : f32 to vector<1x10xf32>
    %3 = arith.mulf %2, %1 : vector<1x10xf32>
    %c0_3 = arith.constant 0 : index
    %c0_4 = arith.constant 0 : index
    %4 = vector.load %arg2[%c0_3, %c0_4] : memref<1x10xf32, #tpu.memory_space<vmem>>, vector<1x10xf32>
    tpu.vector_store %arg2[%c0_3, %c0_4], %3 {strides = array<i32>} : memref<1x10xf32, #tpu.memory_space<vmem>>, vector<1x10xf32>,
    return
  }
}

</mosaic_0001>

<bundles_post_ra>
// kernel: tpu_custom_call.1
= control target key start
LH: loop header
LB: loop body
LE: loop exit
PB: predicated region body
PF: predicated region fallthrough
CT: control target
= control target key end

     0   :  { %vm17_vm0 = vcmask 73728   ;;  %s81_s0 = inlined_call_operand.<no memory space> [shape: f32[1,1], index: 0, kind: input, shape index: {}]   ;;  %s82_s1 = inlined_call_operand.vmem [shape: f32[1,10], index: 1, kind: input, shape index: {}]   ;;  %s83_s2 = inlined_call_operand.hbm [shape: f32[1,10], index: 2, kind: output, shape index: {}]  }
   0x1   :  { %v14_v0 = vld [vmem:[%s82_s1] sm:$0x1]  ;;  %v15_v1 = vstv %s81_s0 }
   0x2   :  { %8 = vsyncpa [#allocation4], 0  ;;  %v16_v2 = vmul.f32 %v15_v1, %v14_v0  ;;  %s56_s13 = smov [#allocation3]  }
   0x3   :  { %s25_s14 = sshll.u32 %s56_s13, 4  ;;  %s26_s14 = int_to_ptr.vmem [resolvable:$true] %s25_s14 }
   0x4   :  { %18 = vst.msk [vmem:[#allocation3] sm:$0x1] %vm17_vm0, %v16_v2  ;;  %s34_s15 = scalar_lea.vmem %s26_s14, 16  ;;  %s38_s16 = scalar_lea.vmem %s26_s14, 32 }
   0x5   :  { %p35_p0 = scmp.ne.s32.totalorder %s26_s14, %s34_s15  ;;  %p39_p1 = scmp.lt.s32.totalorder %s26_s14, %s26_s14 }
   0x6   :  { %p40_p2 = scmp.lt.s32.totalorder %s38_s16, %s34_s15 }
   0x8   :  { %p41_p3 = por %p40_p2, %p39_p1 }
   0xa   :  { %p42_p4 = pnand %p41_p3, %p35_p0 }
   0xc   :  { %45 = shalt.err (!%p42_p4)
}
   0xd   :  { %28 = dma.vmem_to_hbm [thread:$0]  %s26_s14, 16, %s83_s2, [#allocation4]  }
   0xe   :  { %54 = dma.done.wait [#allocation4], 16  }
   0xf   :  { %55 = vsyncadd [#allocation4], 4294967280 }
  0x10   :  { %32 = vsyncpa [#allocation4], 1 }

</bundles_post_ra>
